<compile_context>
chip_gen: v5e
topology: v5e:2x2
jax: 0.10.0
libtpu: 0.0.40
codegen_flags: <defaults>
</compile_context>

<pallas_src>
import jax
import jax.numpy as jnp
from jax.experimental import pallas as pl
from jax.experimental.pallas import tpu as pltpu


def _round_up(x: int, m: int) -> int:
    return ((x + m - 1) // m) * m


def _vmem_capacity_bytes() -> int:
    """Per-core VMEM capacity; falls back to the smallest (v7x) if unknown."""
    try:
        return int(pltpu.get_tpu_info().vmem_capacity_bytes)
    except Exception:
        return 64 * 1024 * 1024


def _pick_tile_m(m, k_pad, e_pad, out_bytes, vmem_budget, tm_max):
    """Largest TM (multiple of 8) whose buffers fit the VMEM budget."""
    # Conservative per-row bytes: double-buffered bf16 patches, double-buffered
    # output, one f32 intermediate row for the accumulator.
    per_row = 2 * k_pad * 2 + 2 * e_pad * out_bytes + e_pad * 4
    # Resident weights + bias (assume two buffers even though fetched once).
    fixed = 2 * (k_pad * e_pad * 2 + e_pad * 4)
    tm = (vmem_budget - fixed) // per_row
    tm = int(max(8, min(tm, tm_max, _round_up(m, 8))))
    # Keep at least two grid steps so a 2-TensorCore part (v7x) splits M.
    if m > 8 and pl.cdiv(m, tm) < 2:
        tm = _round_up(pl.cdiv(m, 2), 8)
    return max(8, (tm // 8) * 8)


def _patch_embed_kernel(patches_ref, w_ref, b_ref, out_ref):
    # patches_ref: [TM, K_pad]    bf16  (streamed over the M grid axis)
    # w_ref:       [K_pad, E_pad] bf16  (resident: constant index_map)
    # b_ref:       [1, E_pad]     f32   (resident)
    # out_ref:     [TM, E_pad]    out dtype
    acc = jnp.dot(patches_ref[...], w_ref[...],
                  preferred_element_type=jnp.float32)
    out_ref[...] = (acc + b_ref[...]).astype(out_ref.dtype)


def local_patch_embedding(x, weight, bias, patch_size, *,
                          out_dtype=None, compute_dtype=jnp.bfloat16,
                          tm_max=2048):
    """
    Args:
      x:      [B, C, H, W]   (NCHW, matching PyTorch)
      weight: [E, C, P, P]   Conv2d weight (OIHW)
      bias:   [E]
    Returns:
      [B, H//P, W//P, E]
    """
    B, C, H, W = x.shape
    E = weight.shape[0]
    P = patch_size
    nH, nW = H // P, W // P
    assert nH > 0 and nW > 0, "image smaller than one patch"
    M = B * nH * nW
    K = C * P * P

    out_dtype = x.dtype if out_dtype is None else jnp.dtype(out_dtype)
    out_bytes = jnp.dtype(out_dtype).itemsize

    K_pad = _round_up(K, 128)     # lane-dense LHS / contraction dim
    E_pad = _round_up(E, 128)     # lane-dense output

    # Floor-crop like Conv2d(stride=P); a no-op slice when H, W divide evenly.
    xc = x[:, :, :nH * P, :nW * P]

    # Single-pass im2col: bf16 cast + transpose + K-pad fuse into one XLA copy.
    # k is ordered (c, ph, pw) to match the OIHW conv weight flattening.
    patches = (
        xc.astype(compute_dtype)
        .reshape(B, C, nH, P, nW, P)
        .transpose(0, 2, 4, 1, 3, 5)            # [B, nH, nW, C, P, P]
        .reshape(M, K)
    )
    if K_pad != K:
        patches = jnp.pad(patches, ((0, 0), (0, K_pad - K)))

    w_flat = weight.reshape(E, K).T.astype(compute_dtype)        # [K, E]
    w_flat = jnp.pad(w_flat, ((0, K_pad - K), (0, E_pad - E)))
    b_row = jnp.pad(bias.astype(jnp.float32).reshape(1, E),
                    ((0, 0), (0, E_pad - E)))

    vmem_cap = _vmem_capacity_bytes()
    budget = min(int(vmem_cap * 0.65), 96 * 1024 * 1024)
    TM = _pick_tile_m(M, K_pad, E_pad, out_bytes, budget, tm_max)
    grid = (pl.cdiv(M, TM),)

    cost = pl.CostEstimate(
        flops=2 * M * K_pad * E_pad,
        transcendentals=0,
        bytes_accessed=(M * K_pad * jnp.dtype(compute_dtype).itemsize
                        + K_pad * E_pad * jnp.dtype(compute_dtype).itemsize
                        + E_pad * 4
                        + M * E_pad * out_bytes),
    )

    out = pl.pallas_call(
        _patch_embed_kernel,
        out_shape=jax.ShapeDtypeStruct((M, E_pad), out_dtype),
        grid_spec=pltpu.PrefetchScalarGridSpec(
            num_scalar_prefetch=0,
            grid=grid,
            in_specs=[
                pl.BlockSpec((TM, K_pad), lambda i: (i, 0)),      # streamed M
                pl.BlockSpec((K_pad, E_pad), lambda i: (0, 0)),   # resident W
                pl.BlockSpec((1, E_pad), lambda i: (0, 0)),       # resident b
            ],
            out_specs=pl.BlockSpec((TM, E_pad), lambda i: (i, 0)),
        ),
        compiler_params=pltpu.CompilerParams(
            dimension_semantics=("parallel",),   # shard M across TCs (v7x)
            vmem_limit_bytes=int(min(vmem_cap * 0.8, 110 * 1024 * 1024)),
        ),
        cost_estimate=cost,
    )(patches, w_flat, b_row)

    return out[:, :E].reshape(B, nH, nW, E)


if __name__ == "__main__":
    # Small shapes consistent with the module's forward.
    B, C, H, W = 2, 4, 16, 16
    patch_size = 4
    embedding_dim = 32

    key = jax.random.PRNGKey(0)
    kx, kw, kb = jax.random.split(key, 3)

    x = jax.random.normal(kx, (B, C, H, W), dtype=jnp.float32)
    # Deterministic synthetic parameters (shapes from nn.Conv2d(C, E, P, P)).
    fan_in = C * patch_size * patch_size
    bound = 1.0 / (fan_in ** 0.5)
    weight = jax.random.uniform(
        kw, (embedding_dim, C, patch_size, patch_size),
        minval=-bound, maxval=bound, dtype=jnp.float32)
    bias = jax.random.uniform(
        kb, (embedding_dim,), minval=-bound, maxval=bound, dtype=jnp.float32)

    fn = jax.jit(lambda x_, w_, b_: local_patch_embedding(x_, w_, b_, patch_size))
    y = jax.block_until_ready(fn(x, weight, bias))

    # Reference: same bf16-quantized operands with f32 accumulation (the
    # kernel's MXU path), via lax conv (NCHW) + permute mirroring PyTorch.
    ref = jax.lax.conv_general_dilated(
        x.astype(jnp.bfloat16), weight.astype(jnp.bfloat16),
        window_strides=(patch_size, patch_size),
        padding="VALID",
        dimension_numbers=("NCHW", "OIHW", "NCHW"),
        preferred_element_type=jnp.float32,
    ) + bias[None, :, None, None]
    ref = jnp.transpose(ref, (0, 2, 3, 1)).astype(x.dtype)

    assert y.shape == (B, H // patch_size, W // patch_size, embedding_dim), y.shape
    err = float(jnp.max(jnp.abs(y - ref)))
    assert err < 1e-2, err
    print("KERNEL_OK")
</pallas_src>

<mosaic_0001>
module attributes {stable_mosaic.version = 11 : i64} {
  func.func @_patch_embed_kernel(%arg0: i32, %arg1: memref<16x128xbf16, #tpu.memory_space<vmem>>, %arg2: memref<128x128xbf16, #tpu.memory_space<vmem>>, %arg3: memref<1x128xf32, #tpu.memory_space<vmem>>, %arg4: memref<16x128xf32, #tpu.memory_space<vmem>>) attributes {dimension_semantics = [#tpu.dimension_semantics<parallel>], iteration_bounds = array<i64: 2>, scalar_prefetch = 0 : i64, scratch_operands = 0 : i64, tpu.core_type = #tpu.core_type<tc>, window_params = [{transform_indices = @transform_0, window_bounds = array<i64: 16, 128>}, {pipeline_mode = #tpu.pipeline_mode<synchronous>, transform_indices = @transform_1, window_bounds = array<i64: 128, 128>}, {pipeline_mode = #tpu.pipeline_mode<synchronous>, transform_indices = @transform_2, window_bounds = array<i64: 1, 128>}, {transform_indices = @transform_3, window_bounds = array<i64: 16, 128>}]} {
    %c0 = arith.constant 0 : index
    %c0_0 = arith.constant 0 : index
    %0 = vector.load %arg1[%c0, %c0_0] : memref<16x128xbf16, #tpu.memory_space<vmem>>, vector<16x128xbf16>
    %c0_1 = arith.constant 0 : index
    %c0_2 = arith.constant 0 : index
    %1 = vector.load %arg2[%c0_1, %c0_2] : memref<128x128xbf16, #tpu.memory_space<vmem>>, vector<128x128xbf16>
    %cst = arith.constant dense<0.000000e+00> : vector<16x128xf32>
    %2 = tpu.matmul %0, %1, %cst {dimension_numbers = #tpu.dot_dimension_numbers<[1], [0], [0], [1], [0, 0, 1, 1], [], []>} : vector<16x128xbf16>, vector<128x128xbf16>, vector<16x128xf32> -> vector<16x128xf32>
    %c0_3 = arith.constant 0 : index
    %c0_4 = arith.constant 0 : index
    %3 = vector.load %arg3[%c0_3, %c0_4] : memref<1x128xf32, #tpu.memory_space<vmem>>, vector<1x128xf32>
    %4 = vector.broadcast %3 : vector<1x128xf32> to vector<16x128xf32>
    %5 = arith.addf %2, %4 : vector<16x128xf32>
    %c0_5 = arith.constant 0 : index
    %c0_6 = arith.constant 0 : index
    %6 = vector.load %arg4[%c0_5, %c0_6] : memref<16x128xf32, #tpu.memory_space<vmem>>, vector<16x128xf32>
    tpu.vector_store %arg4[%c0_5, %c0_6], %5 {strides = array<i32>} : memref<16x128xf32, #tpu.memory_space<vmem>>, vector<16x128xf32>,
    return
  }
  func.func @transform_0(%arg0: i32) -> (i32, i32) {
    %c0_i32 = arith.constant 0 : i32
    %c0_i32_0 = arith.constant 0 : i32
    return %arg0, %c0_i32 : i32, i32
  }
  func.func @transform_1(%arg0: i32) -> (i32, i32) {
    %c0_i32 = arith.constant 0 : i32
    %c0_i32_0 = arith.constant 0 : i32
    %c0_i32_1 = arith.constant 0 : i32
    return %c0_i32, %c0_i32_0 : i32, i32
  }
  func.func @transform_2(%arg0: i32) -> (i32, i32) {
    %c0_i32 = arith.constant 0 : i32
    %c0_i32_0 = arith.constant 0 : i32
    %c0_i32_1 = arith.constant 0 : i32
    return %c0_i32, %c0_i32_0 : i32, i32
  }
  func.func @transform_3(%arg0: i32) -> (i32, i32) {
    %c0_i32 = arith.constant 0 : i32
    %c0_i32_0 = arith.constant 0 : i32
    return %arg0, %c0_i32 : i32, i32
  }
}

</mosaic_0001>

<bundles_post_ra>
// kernel: _lambda_.1
= control target key start
LH: loop header
LB: loop body
LE: loop exit
PB: predicated region body
PF: predicated region fallthrough
CT: control target
= control target key end

     0   :  { %8 = vsyncpa [#allocation3], 0  ;;  %s639_s0 = inlined_call_operand.vmem [shape: bf16[32,128], index: 0, kind: input, shape index: {}]   ;;  %s640_s1 = inlined_call_operand.vmem [shape: bf16[128,128], index: 1, kind: input, shape index: {}]   ;;  %s641_s2 = inlined_call_operand.vmem [shape: f32[1,128], index: 2, kind: input, shape index: {}]   ;;  %s642_s3 = inlined_call_operand.hbm [shape: f32[32,128], index: 3, kind: output, shape index: {}]  }
   0x1   :  { %10 = vsyncpa [#allocation3 + $0x1], 0  ;;  %s528_s12 = smov 0   ;;  %s530_s13 = smov 0  }
   0x2   :  { %s532_s14 = smov 0   ;;  %s534_s15 = smov 0  }
   0x3 LB: > { %s549_s16 = sadd.s32 4294967295, %s504_s15   ;;  %s342_s17 = sadd.s32 4294967294, %s504_s15   ;;  %s504_s15 = sphi %s534_s15, %s648_s15   ;;  %s500_s14 = sphi %s532_s14, %s647_s14   ;;  %s496_s13 = sphi %s530_s13, %s646_s13   ;;  %s492_s12 = sphi %s528_s12, %s645_s12  }
   0x4   : > { %s553_s18 = sadd.s32 1, %s504_s15   ;;  %s91_s19 = sadd.s32 1, %s500_s14 }
   0x5   : > { %s88_s20 = ssub.s32 %s504_s15, %s553_s18  ;;  %p101_p0 = scmp.ne.s32.totalorder %s500_s14, %s496_s13 }
   0x6   : > { %p89_p1 = scmp.eq.s32.totalorder %s88_s20, 0  ;;  %p102_p2 = scmp.eq.s32.totalorder %s549_s16, 1 }
   0x7   : > { %p107_p3 = scmp.ne.s32.totalorder %s496_s13, %s492_s12  ;;  %p108_p4 = scmp.eq.s32.totalorder %s342_s17, 1 }
   0x8   : > { %s564_s21 = scalar_select %p89_p1, %s500_s14, %s91_s19  }
   0x9   : > { %p566_p5 = por %p102_p2, %p101_p0  ;;  %p570_p6 = por %p108_p4, %p107_p3 }
   0xa   : > { %p345_p7 = scmp.ge.s32.totalorder %s504_s15, 1  ;;  %p141_p8 = scmp.lt.s32.totalorder %s504_s15, 3 }
   0xc   : > { %p142_p9 = pnand %p345_p7, %p141_p8 }
   0xd   : > { %s347_s5 = sshll.u32 (!%p142_p9), %s549_s16, 1  ;;  %s162_s27 = sand.u32 (!%p142_p9), 1, %s496_s13  }
   0xe   : > { %145 = sbr.rel (%p142_p9) target bundleno = 191 (0xbf), region = 32  ;;  %p166_p10 = scmp.lt.s32.totalorder (!%p142_p9), %s347_s5, 3 }
   0xf   : > { %s346_s28 = sshll.u32 (!%p142_p9), %s162_s27, 4  ;;  %s399_s4 = sshll.u32 (!%p142_p9), %s549_s16, 4 }
  0x10   : > { %s276_s7 = scalar_lea.hbm (!%p142_p9), %s642_s3, %s399_s4  ;;  %s164_s8 = scalar_lea.vmem (!%p142_p9), [#allocation2], %s346_s28 }
  0x11   : > { %s277_s9 = sshll.u32 (!%p142_p9), %s164_s8, 4  ;;  %s279_s10 = sshll.u32 (!%p142_p9), %s276_s7, 4  ;;  %s278_s9 = int_to_ptr.vmem [resolvable:$true] %s277_s9  ;;  %s280_s10 = int_to_ptr.hbm [resolvable:$true] %s279_s10 }
  0x12   : > { %s265_s11 = scalar_lea.sflag (!%p142_p9), [#allocation3], %s162_s27  ;;  %s462_s24 = scalar_lea.hbm (!%p142_p9), %s642_s3, 32 }
  0x13   : > { %v398_v0 = vld [vmem:[%s640_s1 + $0x38] sm:$0xff]  ;;  %v397_v1 = vld [vmem:[%s640_s1 + $0x30] sm:$0xff]  ;;  %v396_v2 = vld [vmem:[%s640_s1 + $0x28] sm:$0xff]  ;;  %s650_s5 = smov (!%p166_p10, %s347_s5), 3 }
  0x14   : > { %248 = vmatpush.bf16.msra.mxu0 %v398_v0  ;;  %v395_v3 = vld [vmem:[%s640_s1 + $0x20] sm:$0xff]  ;;  %v394_v4 = vld [vmem:[%s640_s1 + $0x18] sm:$0xff]  ;;  %v393_v5 = vld [vmem:[%s640_s1 + $0x10] sm:$0xff]  ;;  %s348_s17 = sshll.u32 %s650_s5, 2 }
  0x15   : > { %v392_v6 = vld [vmem:[%s640_s1 + $0x8] sm:$0xff]  ;;  %v391_v7 = vld [vmem:[%s640_s1] sm:$0xff]  ;;  %s169_s26 = scalar_lea.vmem %s639_s0, %s348_s17  ;;  %s456_s17 = sshra.s32 %s280_s10, 4  ;;  %s457_s17 = int_to_ptr.hbm [resolvable:$true] %s456_s17 }
  0x16   : > { %v390_v8 = vld [vmem:[%s169_s26] sm:$0xff]  ;;  %s458_s16 = scalar_lea.hbm %s457_s17, 16  ;;  %p463_p0 = scmp.lt.s32.totalorder %s457_s17, %s642_s3 }
  0x17   : > { %v441_v9 = vld [vmem:[%s641_s2] ss:$0 sm:$0xff]  ;;  %p459_p11 = scmp.ne.s32.totalorder %s457_s17, %s458_s16  ;;  %p464_p1 = scmp.lt.s32.totalorder %s462_s24, %s458_s16 }
  0x18   : > { %249 = vmatpush.bf16.msra.mxu0 %v397_v1 }
  0x19   : > { %p460_p12 = pnand %p459_p11, %p566_p5  ;;  %p465_p2 = por %p464_p1, %p463_p0 }
  0x1b   : > { %p461_p13 = pneg %p460_p12 }
  0x1c   : > { %250 = vmatpush.bf16.msra.mxu0 %v396_v2 }
  0x1d   : > { %p466_p3 = pnand %p465_p2, %p461_p13 }
  0x20   : > { %251 = vmatpush.bf16.msra.mxu0 %v395_v3 }
  0x24   : > { %252 = vmatpush.bf16.msra.mxu0 %v394_v4 }
  0x28   : > { %253 = vmatpush.bf16.msra.mxu0 %v393_v5 }
  0x2c   : > { %254 = vmatpush.bf16.msra.mxu0 %v392_v6 }
  0x30   : > { %255 = vmatpush.bf16.msra.mxu0 %v391_v7 }
  0x33   : > { %256 = vmatmul.bf16.vlgmr.msra.gmra.mxu0 %v390_v8 }
  0xb0   : > { %v257_v10 = vpop.f32.mrf.mxu0 }
  0xb1   : > { %v258_v11 = vadd.f32 %v441_v9, %v257_v10 }
  0xb3   : > { %262 = vst [vmem:[%s164_s8] sm:$0xff] %v258_v11 }
  0xb8   : > { %v259_v12 = vpop.f32.mrf.mxu0 }
  0xb9   : > { %v260_v13 = vadd.f32 %v441_v9, %v259_v12 }
  0xbb   : > { %263 = vst [vmem:[%s164_s8 + $0x8] sm:$0xff] %v260_v13 }
  0xbc   : > { %469 = shalt.err (!%p466_p3)
}
  0xbd   : > { %s506_s27 = smov 128   ;;  %s507_s28 = smov 8  }
  0xbe   : > { %400 = dma.vmem_to_hbm [thread:$0]  (%p566_p5), %s278_s9, 256, %s280_s10, %s265_s11, %s506_s27, %s506_s27, %s507_s28  }
  0xbf PF: > { %p406_p4 = scmp.ge.s32.totalorder %s504_s15, 2  ;;  %s294_s29 = sand.u32 1, %s492_s12  }
  0xc0   : > { %s295_s30 = scalar_lea.sflag [#allocation3], %s294_s29 }
  0xc1   : > { %p403_p7 = pnand %p406_p4, %p570_p6 }
  0xc3   : > { %p404_p8 = pneg %p403_p7 }
  0xc5   : > { %487 = dma.done.wait (%p404_p8), %s295_s30, 256  }
  0xc6   : > { %489 = vsyncadd (%p404_p8), %s295_s30, 4294967040  ;;  %p13_p9 = scmp.ge.s32.totalorder %s553_s18, 4   ;;  %s645_s12 = smov %s496_s13 }
  0xc7   : > { %s646_s13 = smov %s500_s14  ;;  %s647_s14 = smov %s564_s21 }
  0xc8   : > { %s648_s15 = smov %s553_s18  ;;  %15 = sbr.rel (!%p13_p9) target bundleno = 3 (0x3), region = 67 }
  0xcd   :  { %301 = vsyncpa [#allocation3], 1 }
  0xce   :  { %303 = vsyncpa [#allocation3 + $0x1], 1 }

</bundles_post_ra>
